<compile_context>
chip_gen: v6e
topology: v6e:2x2x1
jax: 0.10.0
libtpu: 0.0.40
codegen_flags: <defaults>
</compile_context>

<pallas_src>
from functools import partial

import jax
import jax.numpy as jnp
from jax.experimental import pallas as pl
from jax.experimental.pallas import tpu as pltpu


def _round_up(n: int, m: int) -> int:
    return (n + m - 1) // m * m


def _discriminator_kernel(x_ref, w1_ref, b1_ref, w2_ref, b2_ref, w3_ref, b3_ref,
                          y_ref, f1_ref, f2_ref):
    # Layer 1: [TB,784] @ [784,256] on the MXU, f32 accumulate, bias+ReLU in f32.
    h1 = jnp.dot(x_ref[...], w1_ref[...], preferred_element_type=jnp.float32)
    f1 = jnp.maximum(h1 + b1_ref[...], 0.0)
    f1_ref[...] = f1.astype(f1_ref.dtype)

    # Layer 2: [TB,256] @ [256,64] on the MXU (activation cast to the matmul dtype).
    h2 = jnp.dot(f1.astype(w2_ref.dtype), w2_ref[...],
                 preferred_element_type=jnp.float32)
    f2 = jnp.maximum(h2 + b2_ref[...], 0.0)
    f2_ref[...] = f2.astype(f2_ref.dtype)

    # Layer 3: 64 -> 1. An N=1 matmul wastes the MXU; do VPU multiply + lane
    # reduce instead. w3_ref is the single weight row [1,64], b3_ref is [1,1].
    h3 = jnp.sum(f2 * w3_ref[...], axis=-1, keepdims=True) + b3_ref[...]
    y_ref[...] = (1.0 / (1.0 + jnp.exp(-h3))).astype(y_ref.dtype)


def prepare_params(params, *, use_bf16_matmul=False):
    """One-time param prep: transpose to [in,out], reshape biases, pick matmul dtype.

    `params` follows nn.Linear convention: w* is (out_features, in_features).
    """
    mm = jnp.bfloat16 if use_bf16_matmul else jnp.float32
    return {
        "w1": jnp.asarray(params["w1"]).T.astype(mm),                 # [784, 256]
        "w2": jnp.asarray(params["w2"]).T.astype(mm),                 # [256, 64]
        "w3": jnp.asarray(params["w3"]).reshape(1, 64).astype(jnp.float32),  # row for VPU layer 3
        "b1": jnp.asarray(params["b1"]).reshape(1, -1).astype(jnp.float32),  # [1, 256]
        "b2": jnp.asarray(params["b2"]).reshape(1, -1).astype(jnp.float32),  # [1, 64]
        "b3": jnp.asarray(params["b3"]).reshape(1, 1).astype(jnp.float32),   # [1, 1]
    }


@partial(jax.jit, static_argnames=("block_batch",))
def discriminator_forward(x, prepared, block_batch=512):
    """x: [B, 784]. prepared: output of prepare_params.

    Returns (y_hat [B,1], feats1 [B,256], feats2 [B,64]) in float32, matching
    Discriminator.forward semantics.
    """
    B = x.shape[0]
    # Match the matmul input dtype (f32 or bf16) so the x DMA is half-size in bf16 mode.
    x = x.astype(prepared["w1"].dtype)

    # Batch tile: multiple of 8 sublanes, capped at block_batch (512 amortizes
    # per-step grid overhead and fills the MXU systolic rows on v6e/v7x).
    TB = min(block_batch, _round_up(B, 8))
    B_pad = _round_up(B, TB)
    if B_pad != B:
        x = jnp.pad(x, ((0, B_pad - B), (0, 0)))

    grid = (B_pad // TB,)

    # Weights/biases: block index never changes -> Pallas keeps them resident (no re-DMA).
    pinned = lambda shape: pl.BlockSpec(shape, lambda i: (0, 0))

    out_shapes = (
        jax.ShapeDtypeStruct((B_pad, 1), jnp.float32),    # y_hat
        jax.ShapeDtypeStruct((B_pad, 256), jnp.float32),  # feats1
        jax.ShapeDtypeStruct((B_pad, 64), jnp.float32),   # feats2
    )

    y, f1, f2 = pl.pallas_call(
        _discriminator_kernel,
        out_shape=out_shapes,
        grid=grid,
        in_specs=[
            pl.BlockSpec((TB, 784), lambda i: (i, 0)),
            pinned(prepared["w1"].shape), pinned(prepared["b1"].shape),
            pinned(prepared["w2"].shape), pinned(prepared["b2"].shape),
            pinned(prepared["w3"].shape), pinned(prepared["b3"].shape),
        ],
        out_specs=(
            pl.BlockSpec((TB, 1), lambda i: (i, 0)),
            pl.BlockSpec((TB, 256), lambda i: (i, 0)),
            pl.BlockSpec((TB, 64), lambda i: (i, 0)),
        ),
        compiler_params=pltpu.CompilerParams(
            dimension_semantics=("parallel",),
        ),
    )(x, prepared["w1"], prepared["b1"], prepared["w2"], prepared["b2"],
      prepared["w3"], prepared["b3"])

    if B_pad != B:
        y, f1, f2 = y[:B], f1[:B], f2[:B]
    return y, f1, f2


def init_params(key):
    """Deterministic init; shapes follow nn.Linear (out_features, in_features)."""
    k1, k2, k3, k4, k5, k6 = jax.random.split(key, 6)

    def lin(kw, kb, out_f, in_f):
        bound = 1.0 / jnp.sqrt(in_f)
        w = jax.random.uniform(kw, (out_f, in_f), jnp.float32, -bound, bound)
        b = jax.random.uniform(kb, (out_f,), jnp.float32, -bound, bound)
        return w, b

    w1, b1 = lin(k1, k2, 256, 784)
    w2, b2 = lin(k3, k4, 64, 256)
    w3, b3 = lin(k5, k6, 1, 64)
    return {"w1": w1, "b1": b1, "w2": w2, "b2": b2, "w3": w3, "b3": b3}


def _reference_forward(x, params):
    f1 = jax.nn.relu(x @ params["w1"].T + params["b1"])
    f2 = jax.nn.relu(f1 @ params["w2"].T + params["b2"])
    y = jax.nn.sigmoid(f2 @ params["w3"].T + params["b3"])
    return y, f1, f2


if __name__ == "__main__":
    key = jax.random.PRNGKey(0)
    kx, kp = jax.random.split(key)
    params = init_params(kp)

    # B deliberately not a multiple of 8 to exercise the padding / slicing path.
    B = 13
    x = jax.random.normal(kx, (B, 784), jnp.float32)
    y_ref, f1_ref, f2_ref = _reference_forward(x, params)

    # --- f32 path (exact) ---
    prep_f32 = prepare_params(params)
    y_hat, feats1, feats2 = discriminator_forward(x, prep_f32)
    jax.block_until_ready((y_hat, feats1, feats2))

    assert y_hat.shape == (B, 1) and feats1.shape == (B, 256) and feats2.shape == (B, 64)
    assert jnp.allclose(feats1, f1_ref, atol=1e-5)
    assert jnp.allclose(feats2, f2_ref, atol=1e-5)
    assert jnp.allclose(y_hat, y_ref, atol=1e-5)

    # --- bf16 matmul-input path (v6e/v7x fast path), looser tolerance ---
    prep_bf16 = prepare_params(params, use_bf16_matmul=True)
    y_b, f1_b, f2_b = discriminator_forward(x, prep_bf16)
    jax.block_until_ready((y_b, f1_b, f2_b))

    assert jnp.allclose(f1_b, f1_ref, atol=1e-1, rtol=1e-1)
    assert jnp.allclose(f2_b, f2_ref, atol=1e-1, rtol=1e-1)
    assert jnp.allclose(y_b, y_ref, atol=5e-2, rtol=1e-1)

    print("KERNEL_OK")
</pallas_src>

<mosaic_0001>
module attributes {stable_mosaic.version = 11 : i64} {
  func.func @_discriminator_kernel(%arg0: i32, %arg1: memref<16x784xf32, #tpu.memory_space<vmem>>, %arg2: memref<784x256xf32, #tpu.memory_space<vmem>>, %arg3: memref<1x256xf32, #tpu.memory_space<vmem>>, %arg4: memref<256x64xf32, #tpu.memory_space<vmem>>, %arg5: memref<1x64xf32, #tpu.memory_space<vmem>>, %arg6: memref<1x64xf32, #tpu.memory_space<vmem>>, %arg7: memref<1x1xf32, #tpu.memory_space<vmem>>, %arg8: memref<16x1xf32, #tpu.memory_space<vmem>>, %arg9: memref<16x256xf32, #tpu.memory_space<vmem>>, %arg10: memref<16x64xf32, #tpu.memory_space<vmem>>) attributes {dimension_semantics = [#tpu.dimension_semantics<parallel>], iteration_bounds = array<i64: 1>, scalar_prefetch = 0 : i64, scratch_operands = 0 : i64, tpu.core_type = #tpu.core_type<tc>, window_params = [{transform_indices = @transform_0, window_bounds = array<i64: 16, 784>}, {pipeline_mode = #tpu.pipeline_mode<synchronous>, transform_indices = @transform_1, window_bounds = array<i64: 784, 256>}, {pipeline_mode = #tpu.pipeline_mode<synchronous>, transform_indices = @transform_2, window_bounds = array<i64: 1, 256>}, {pipeline_mode = #tpu.pipeline_mode<synchronous>, transform_indices = @transform_3, window_bounds = array<i64: 256, 64>}, {pipeline_mode = #tpu.pipeline_mode<synchronous>, transform_indices = @transform_4, window_bounds = array<i64: 1, 64>}, {pipeline_mode = #tpu.pipeline_mode<synchronous>, transform_indices = @transform_5, window_bounds = array<i64: 1, 64>}, {pipeline_mode = #tpu.pipeline_mode<synchronous>, transform_indices = @transform_6, window_bounds = array<i64: 1, 1>}, {transform_indices = @transform_7, window_bounds = array<i64: 16, 1>}, {transform_indices = @transform_8, window_bounds = array<i64: 16, 256>}, {transform_indices = @transform_9, window_bounds = array<i64: 16, 64>}]} {
    %c0 = arith.constant 0 : index
    %c0_0 = arith.constant 0 : index
    %0 = vector.load %arg1[%c0, %c0_0] : memref<16x784xf32, #tpu.memory_space<vmem>>, vector<16x784xf32>
    %c0_1 = arith.constant 0 : index
    %c0_2 = arith.constant 0 : index
    %1 = vector.load %arg2[%c0_1, %c0_2] : memref<784x256xf32, #tpu.memory_space<vmem>>, vector<784x256xf32>
    %cst = arith.constant dense<0.000000e+00> : vector<16x256xf32>
    %2 = tpu.matmul %0, %1, %cst {dimension_numbers = #tpu.dot_dimension_numbers<[1], [0], [0], [1], [0, 0, 1, 1], [], []>} : vector<16x784xf32>, vector<784x256xf32>, vector<16x256xf32> -> vector<16x256xf32>
    %c0_3 = arith.constant 0 : index
    %c0_4 = arith.constant 0 : index
    %3 = vector.load %arg3[%c0_3, %c0_4] : memref<1x256xf32, #tpu.memory_space<vmem>>, vector<1x256xf32>
    %4 = vector.broadcast %3 : vector<1x256xf32> to vector<16x256xf32>
    %5 = arith.addf %2, %4 : vector<16x256xf32>
    %cst_5 = arith.constant 0.000000e+00 : f32
    %6 = vector.broadcast %cst_5 : f32 to vector<16x256xf32>
    %7 = arith.maximumf %5, %6 : vector<16x256xf32>
    %c0_6 = arith.constant 0 : index
    %c0_7 = arith.constant 0 : index
    %8 = vector.load %arg9[%c0_6, %c0_7] : memref<16x256xf32, #tpu.memory_space<vmem>>, vector<16x256xf32>
    tpu.vector_store %arg9[%c0_6, %c0_7], %7 {strides = array<i32>} : memref<16x256xf32, #tpu.memory_space<vmem>>, vector<16x256xf32>,
    %c0_8 = arith.constant 0 : index
    %c0_9 = arith.constant 0 : index
    %9 = vector.load %arg4[%c0_8, %c0_9] : memref<256x64xf32, #tpu.memory_space<vmem>>, vector<256x64xf32>
    %cst_10 = arith.constant dense<0.000000e+00> : vector<16x64xf32>
    %10 = tpu.matmul %7, %9, %cst_10 {dimension_numbers = #tpu.dot_dimension_numbers<[1], [0], [0], [1], [0, 0, 1, 1], [], []>} : vector<16x256xf32>, vector<256x64xf32>, vector<16x64xf32> -> vector<16x64xf32>
    %c0_11 = arith.constant 0 : index
    %c0_12 = arith.constant 0 : index
    %11 = vector.load %arg5[%c0_11, %c0_12] : memref<1x64xf32, #tpu.memory_space<vmem>>, vector<1x64xf32>
    %12 = vector.broadcast %11 : vector<1x64xf32> to vector<16x64xf32>
    %13 = arith.addf %10, %12 : vector<16x64xf32>
    %cst_13 = arith.constant 0.000000e+00 : f32
    %14 = vector.broadcast %cst_13 : f32 to vector<16x64xf32>
    %15 = arith.maximumf %13, %14 : vector<16x64xf32>
    %c0_14 = arith.constant 0 : index
    %c0_15 = arith.constant 0 : index
    %16 = vector.load %arg10[%c0_14, %c0_15] : memref<16x64xf32, #tpu.memory_space<vmem>>, vector<16x64xf32>
    tpu.vector_store %arg10[%c0_14, %c0_15], %15 {strides = array<i32>} : memref<16x64xf32, #tpu.memory_space<vmem>>, vector<16x64xf32>,
    %c0_16 = arith.constant 0 : index
    %c0_17 = arith.constant 0 : index
    %17 = vector.load %arg6[%c0_16, %c0_17] : memref<1x64xf32, #tpu.memory_space<vmem>>, vector<1x64xf32>
    %18 = vector.broadcast %17 : vector<1x64xf32> to vector<16x64xf32>
    %19 = arith.mulf %15, %18 : vector<16x64xf32>
    %cst_18 = arith.constant dense<0.000000e+00> : vector<16xf32>
    %20 = vector.multi_reduction <add>, %19, %cst_18 [1] : vector<16x64xf32> to vector<16xf32>
    %21 = vector.shape_cast %20 : vector<16xf32> to vector<16x1xf32>
    %c0_19 = arith.constant 0 : index
    %c0_20 = arith.constant 0 : index
    %22 = vector.load %arg7[%c0_19, %c0_20] : memref<1x1xf32, #tpu.memory_space<vmem>>, vector<1x1xf32>
    %23 = vector.broadcast %22 : vector<1x1xf32> to vector<16x1xf32>
    %24 = arith.addf %21, %23 : vector<16x1xf32>
    %cst_21 = arith.constant 0.000000e+00 : f32
    %25 = vector.broadcast %cst_21 : f32 to vector<16x1xf32>
    %26 = arith.subf %25, %24 : vector<16x1xf32>
    %27 = math.exp %26 : vector<16x1xf32>
    %cst_22 = arith.constant 1.000000e+00 : f32
    %28 = vector.broadcast %cst_22 : f32 to vector<16x1xf32>
    %29 = arith.addf %28, %27 : vector<16x1xf32>
    %cst_23 = arith.constant 1.000000e+00 : f32
    %30 = vector.broadcast %cst_23 : f32 to vector<16x1xf32>
    %31 = arith.divf %30, %29 : vector<16x1xf32>
    %c0_24 = arith.constant 0 : index
    %c0_25 = arith.constant 0 : index
    %32 = vector.load %arg8[%c0_24, %c0_25] : memref<16x1xf32, #tpu.memory_space<vmem>>, vector<16x1xf32>
    tpu.vector_store %arg8[%c0_24, %c0_25], %31 {strides = array<i32>} : memref<16x1xf32, #tpu.memory_space<vmem>>, vector<16x1xf32>,
    return
  }
  func.func @transform_0(%arg0: i32) -> (i32, i32) {
    %c0_i32 = arith.constant 0 : i32
    %c0_i32_0 = arith.constant 0 : i32
    return %arg0, %c0_i32 : i32, i32
  }
  func.func @transform_1(%arg0: i32) -> (i32, i32) {
    %c0_i32 = arith.constant 0 : i32
    %c0_i32_0 = arith.constant 0 : i32
    %c0_i32_1 = arith.constant 0 : i32
    return %c0_i32, %c0_i32_0 : i32, i32
  }
  func.func @transform_2(%arg0: i32) -> (i32, i32) {
    %c0_i32 = arith.constant 0 : i32
    %c0_i32_0 = arith.constant 0 : i32
    %c0_i32_1 = arith.constant 0 : i32
    return %c0_i32, %c0_i32_0 : i32, i32
  }
  func.func @transform_3(%arg0: i32) -> (i32, i32) {
    %c0_i32 = arith.constant 0 : i32
    %c0_i32_0 = arith.constant 0 : i32
    %c0_i32_1 = arith.constant 0 : i32
    return %c0_i32, %c0_i32_0 : i32, i32
  }
  func.func @transform_4(%arg0: i32) -> (i32, i32) {
    %c0_i32 = arith.constant 0 : i32
    %c0_i32_0 = arith.constant 0 : i32
    %c0_i32_1 = arith.constant 0 : i32
    return %c0_i32, %c0_i32_0 : i32, i32
  }
  func.func @transform_5(%arg0: i32) -> (i32, i32) {
    %c0_i32 = arith.constant 0 : i32
    %c0_i32_0 = arith.constant 0 : i32
    %c0_i32_1 = arith.constant 0 : i32
    return %c0_i32, %c0_i32_0 : i32, i32
  }
  func.func @transform_6(%arg0: i32) -> (i32, i32) {
    %c0_i32 = arith.constant 0 : i32
    %c0_i32_0 = arith.constant 0 : i32
    %c0_i32_1 = arith.constant 0 : i32
    return %c0_i32, %c0_i32_0 : i32, i32
  }
  func.func @transform_7(%arg0: i32) -> (i32, i32) {
    %c0_i32 = arith.constant 0 : i32
    %c0_i32_0 = arith.constant 0 : i32
    return %arg0, %c0_i32 : i32, i32
  }
  func.func @transform_8(%arg0: i32) -> (i32, i32) {
    %c0_i32 = arith.constant 0 : i32
    %c0_i32_0 = arith.constant 0 : i32
    return %arg0, %c0_i32 : i32, i32
  }
  func.func @transform_9(%arg0: i32) -> (i32, i32) {
    %c0_i32 = arith.constant 0 : i32
    %c0_i32_0 = arith.constant 0 : i32
    return %arg0, %c0_i32 : i32, i32
  }
}

</mosaic_0001>

<bundles_post_ra>
// kernel: discriminator_forward.1
= control target key start
LH: loop header
LB: loop body
LE: loop exit
PB: predicated region body
PF: predicated region fallthrough
CT: control target
= control target key end

     0   :  { %s1143_s0 = inlined_call_operand.vmem [shape: f32[16,784], index: 0, kind: input, shape index: {}]   ;;  %s1144_s1 = inlined_call_operand.hbm [shape: f32[784,256], index: 1, kind: input, shape index: {}]   ;;  %s1145_s2 = inlined_call_operand.vmem [shape: f32[1,256], index: 2, kind: input, shape index: {}]   ;;  %s1146_s3 = inlined_call_operand.vmem [shape: f32[256,64], index: 3, kind: input, shape index: {}]   ;;  %s1147_s4 = inlined_call_operand.vmem [shape: f32[1,64], index: 4, kind: input, shape index: {}]   ;;  %s1148_s5 = inlined_call_operand.vmem [shape: f32[1,64], index: 5, kind: input, shape index: {}]   ;;  %s1149_s6 = inlined_call_operand.<no memory space> [shape: f32[1,1], index: 6, kind: input, shape index: {}]   ;;  %s1150_s7 = inlined_call_operand.vmem [shape: f32[16,1], index: 7, kind: output, shape index: {0}]   ;;  %s1151_s8 = inlined_call_operand.hbm [shape: f32[16,256], index: 8, kind: output, shape index: {1}]   ;;  %s1152_s9 = inlined_call_operand.hbm [shape: f32[16,64], index: 9, kind: output, shape index: {2}]  }
   0x1   :  { %v15_v0 = vstv %s1149_s6 }
   0x2   :  { %16 = vst [vmem:[#allocation2] sm:$0x1] %v15_v0 }
   0x3   :  { %17 = vsyncpa [#allocation4], 0 }
   0x4   :  { %18 = vsyncpa [#allocation5], 0 }
   0x5   :  { %19 = vsyncpa [#allocation8], 0  ;;  %s912_s11 = smov [#allocation3]  }
   0x6   :  { %s27_s12 = sshll.u32 %s912_s11, 4  ;;  %s28_s12 = int_to_ptr.vmem [resolvable:$true] %s27_s12 }
   0x7   :  { %s854_s13 = scalar_lea.vmem %s28_s12, 25088  ;;  %p859_p1 = scmp.lt.s32.totalorder %s28_s12, %s28_s12 }
   0x8   :  { %p855_p0 = scmp.ne.s32.totalorder %s28_s12, %s854_s13  ;;  %p860_p2 = scmp.lt.s32.totalorder %s854_s13, %s854_s13 }
   0xa   :  { %p861_p3 = por %p860_p2, %p859_p1 }
   0xc   :  { %p862_p4 = pnand %p861_p3, %p855_p0 }
   0xe   :  { %865 = shalt.err (!%p862_p4)
}
   0xf   :  { %s913_s14 = smov 256   ;;  %s914_s15 = smov 16  }
  0x10   :  { %33 = dma.hbm_to_vmem [thread:$0]  %s1144_s1, 25088, %s28_s12, [#allocation4], %s913_s14, %s913_s14, %s914_s15  }
  0x11   :  { %906 = dma.done.wait [#allocation4], 25088  }
  0x12   :  { %907 = vsyncadd [#allocation4], 4294942208  ;;  %v92_v1 = vld [vmem:[#allocation3 + $0xf8] sm:$0xff]  ;;  %v91_v2 = vld [vmem:[#allocation3 + $0xf0] sm:$0xff]  ;;  %vm269_vm0 = vcmask 130048   ;;  %vm708_vm1 = vcmask 523264  }
  0x13   :  { %v90_v3 = vld [vmem:[#allocation3 + $0xe8] sm:$0xff]  ;;  %276 = vmatprep.subr.mxu0 %v92_v1  ;;  %v156_v4 = vld [vmem:[#allocation3 + $0x2f8] sm:$0xff]  ;;  %v89_v5 = vld [vmem:[#allocation3 + $0xe0] sm:$0xff]  ;;  %s917_s26 = smov [#allocation7]  }
  0x14   :  { %v155_v6 = vld [vmem:[#allocation3 + $0x2f0] sm:$0xff]  ;;  %277 = vmatpush1.msra.mxu0 %v91_v2  ;;  %353 = vmatprep.subr.mxu1 %v156_v4  ;;  %v88_v7 = vld [vmem:[#allocation3 + $0xd8] sm:$0xff]  ;;  %v154_v8 = vld [vmem:[#allocation3 + $0x2e8] sm:$0xff]  ;;  %s769_s27 = sshll.u32 %s917_s26, 4  ;;  %s770_s27 = int_to_ptr.vmem [resolvable:$true] %s769_s27 }
  0x15   :  { %278 = vmatprep.subr.mxu0 %v90_v3  ;;  %354 = vmatpush1.msra.mxu1 %v155_v6  ;;  %v87_v9 = vld [vmem:[#allocation3 + $0xd0] sm:$0xff]  ;;  %v153_v10 = vld [vmem:[#allocation3 + $0x2e0] sm:$0xff]  ;;  %v152_v11 = vld [vmem:[#allocation3 + $0x2d8] sm:$0xff] }
  0x16   :  { %279 = vmatpush1.msra.mxu0 %v89_v5  ;;  %355 = vmatprep.subr.mxu1 %v154_v8  ;;  %v86_v12 = vld [vmem:[#allocation3 + $0xc8] sm:$0xff]  ;;  %v151_v13 = vld [vmem:[#allocation3 + $0x2d0] sm:$0xff]  ;;  %v85_v14 = vld [vmem:[#allocation3 + $0xc0] sm:$0xff] }
  0x17   :  { %280 = vmatprep.subr.mxu0 %v88_v7  ;;  %356 = vmatpush1.msra.mxu1 %v153_v10  ;;  %v150_v15 = vld [vmem:[#allocation3 + $0x2c8] sm:$0xff]  ;;  %v84_v16 = vld [vmem:[#allocation3 + $0xb8] sm:$0xff]  ;;  %v149_v17 = vld [vmem:[#allocation3 + $0x2c0] sm:$0xff] }
  0x18   :  { %281 = vmatpush1.msra.mxu0 %v87_v9  ;;  %357 = vmatprep.subr.mxu1 %v152_v11  ;;  %v83_v18 = vld [vmem:[#allocation3 + $0xb0] sm:$0xff]  ;;  %v148_v19 = vld [vmem:[#allocation3 + $0x2b8] sm:$0xff]  ;;  %v82_v20 = vld [vmem:[#allocation3 + $0xa8] sm:$0xff] }
  0x19   :  { %282 = vmatprep.subr.mxu0 %v86_v12  ;;  %358 = vmatpush1.msra.mxu1 %v151_v13  ;;  %v147_v21 = vld [vmem:[#allocation3 + $0x2b0] sm:$0xff]  ;;  %v81_v22 = vld [vmem:[#allocation3 + $0xa0] sm:$0xff]  ;;  %v146_v23 = vld [vmem:[#allocation3 + $0x2a8] sm:$0xff] }
  0x1a   :  { %283 = vmatpush1.msra.mxu0 %v85_v14  ;;  %359 = vmatprep.subr.mxu1 %v150_v15  ;;  %v80_v24 = vld [vmem:[#allocation3 + $0x98] sm:$0xff]  ;;  %v145_v25 = vld [vmem:[#allocation3 + $0x2a0] sm:$0xff]  ;;  %v79_v26 = vld [vmem:[#allocation3 + $0x90] sm:$0xff] }
  0x1b   :  { %284 = vmatprep.subr.mxu0 %v84_v16  ;;  %360 = vmatpush1.msra.mxu1 %v149_v17  ;;  %v144_v27 = vld [vmem:[#allocation3 + $0x298] sm:$0xff]  ;;  %v78_v28 = vld [vmem:[#allocation3 + $0x88] sm:$0xff]  ;;  %v143_v29 = vld [vmem:[#allocation3 + $0x290] sm:$0xff] }
  0x1c   :  { %285 = vmatpush1.msra.mxu0 %v83_v18  ;;  %361 = vmatprep.subr.mxu1 %v148_v19  ;;  %v77_v30 = vld [vmem:[#allocation3 + $0x80] sm:$0xff]  ;;  %v142_v31 = vld [vmem:[#allocation3 + $0x288] sm:$0xff]  ;;  %v76_v32 = vld [vmem:[#allocation3 + $0x78] sm:$0xff] }
  0x1d   :  { %286 = vmatprep.subr.mxu0 %v82_v20  ;;  %362 = vmatpush1.msra.mxu1 %v147_v21  ;;  %v141_v33 = vld [vmem:[#allocation3 + $0x280] sm:$0xff]  ;;  %v75_v34 = vld [vmem:[#allocation3 + $0x70] sm:$0xff]  ;;  %v140_v35 = vld [vmem:[#allocation3 + $0x278] sm:$0xff] }
  0x1e   :  { %287 = vmatpush1.msra.mxu0 %v81_v22  ;;  %363 = vmatprep.subr.mxu1 %v146_v23  ;;  %v74_v36 = vld [vmem:[#allocation3 + $0x68] sm:$0xff]  ;;  %v139_v37 = vld [vmem:[#allocation3 + $0x270] sm:$0xff]  ;;  %v73_v38 = vld [vmem:[#allocation3 + $0x60] sm:$0xff] }
  0x1f   :  { %288 = vmatprep.subr.mxu0 %v80_v24  ;;  %364 = vmatpush1.msra.mxu1 %v145_v25  ;;  %v138_v39 = vld [vmem:[#allocation3 + $0x268] sm:$0xff]  ;;  %v72_v40 = vld [vmem:[#allocation3 + $0x58] sm:$0xff]  ;;  %v137_v41 = vld [vmem:[#allocation3 + $0x260] sm:$0xff] }
  0x20   :  { %289 = vmatpush1.msra.mxu0 %v79_v26  ;;  %365 = vmatprep.subr.mxu1 %v144_v27  ;;  %v71_v42 = vld [vmem:[#allocation3 + $0x50] sm:$0xff]  ;;  %v136_v43 = vld [vmem:[#allocation3 + $0x258] sm:$0xff]  ;;  %v70_v44 = vld [vmem:[#allocation3 + $0x48] sm:$0xff] }
  0x21   :  { %290 = vmatprep.subr.mxu0 %v78_v28  ;;  %366 = vmatpush1.msra.mxu1 %v143_v29  ;;  %v135_v45 = vld [vmem:[#allocation3 + $0x250] sm:$0xff]  ;;  %v69_v46 = vld [vmem:[#allocation3 + $0x40] sm:$0xff]  ;;  %v134_v47 = vld [vmem:[#allocation3 + $0x248] sm:$0xff] }
  0x22   :  { %291 = vmatpush1.msra.mxu0 %v77_v30  ;;  %367 = vmatprep.subr.mxu1 %v142_v31  ;;  %v68_v48 = vld [vmem:[#allocation3 + $0x38] sm:$0xff]  ;;  %v133_v49 = vld [vmem:[#allocation3 + $0x240] sm:$0xff]  ;;  %v67_v50 = vld [vmem:[#allocation3 + $0x30] sm:$0xff] }
  0x23   :  { %292 = vmatprep.subr.mxu0 %v76_v32  ;;  %368 = vmatpush1.msra.mxu1 %v141_v33  ;;  %v132_v51 = vld [vmem:[#allocation3 + $0x238] sm:$0xff]  ;;  %v66_v52 = vld [vmem:[#allocation3 + $0x28] sm:$0xff]  ;;  %v131_v53 = vld [vmem:[#allocation3 + $0x230] sm:$0xff] }
  0x24   :  { %293 = vmatpush1.msra.mxu0 %v75_v34  ;;  %369 = vmatprep.subr.mxu1 %v140_v35  ;;  %v65_v54 = vld [vmem:[#allocation3 + $0x20] sm:$0xff]  ;;  %v130_v55 = vld [vmem:[#allocation3 + $0x228] sm:$0xff]  ;;  %v64_v56 = vld [vmem:[#allocation3 + $0x18] sm:$0xff] }
  0x25   :  { %294 = vmatprep.subr.mxu0 %v74_v36  ;;  %370 = vmatpush1.msra.mxu1 %v139_v37  ;;  %v129_v57 = vld [vmem:[#allocation3 + $0x220] sm:$0xff]  ;;  %v63_v58 = vld [vmem:[#allocation3 + $0x10] sm:$0xff]  ;;  %v128_v59 = vld [vmem:[#allocation3 + $0x218] sm:$0xff] }
  0x26   :  { %295 = vmatpush1.msra.mxu0 %v73_v38  ;;  %371 = vmatprep.subr.mxu1 %v138_v39  ;;  %v62_v60 = vld [vmem:[#allocation3 + $0x8] sm:$0xff]  ;;  %v127_v61 = vld [vmem:[#allocation3 + $0x210] sm:$0xff]  ;;  %v61_v62 = vld [vmem:[#allocation3] sm:$0xff] }
  0x27   :  { %296 = vmatprep.subr.mxu0 %v72_v40  ;;  %372 = vmatpush1.msra.mxu1 %v137_v41  ;;  %v126_v63 = vld [vmem:[#allocation3 + $0x208] sm:$0xff]  ;;  %v124_v0 = vld [vmem:[#allocation3 + $0x1f8] sm:$0xff]  ;;  %v125_v1 = vld [vmem:[#allocation3 + $0x200] sm:$0xff] }
  0x28   :  { %297 = vmatpush1.msra.mxu0 %v71_v42  ;;  %373 = vmatprep.subr.mxu1 %v136_v43  ;;  %v123_v2 = vld [vmem:[#allocation3 + $0x1f0] sm:$0xff]  ;;  %v188_v3 = vld [vmem:[#allocation3 + $0x3f8] sm:$0xff]  ;;  %v122_v4 = vld [vmem:[#allocation3 + $0x1e8] sm:$0xff] }
  0x29   :  { %298 = vmatprep.subr.mxu0 %v70_v44  ;;  %374 = vmatpush1.msra.mxu1 %v135_v45  ;;  %v187_v5 = vld [vmem:[#allocation3 + $0x3f0] sm:$0xff]  ;;  %v121_v6 = vld [vmem:[#allocation3 + $0x1e0] sm:$0xff]  ;;  %v186_v7 = vld [vmem:[#allocation3 + $0x3e8] sm:$0xff] }
  0x2a   :  { %299 = vmatpush1.msra.mxu0 %v69_v46  ;;  %375 = vmatprep.subr.mxu1 %v134_v47  ;;  %v120_v8 = vld [vmem:[#allocation3 + $0x1d8] sm:$0xff]  ;;  %v185_v9 = vld [vmem:[#allocation3 + $0x3e0] sm:$0xff]  ;;  %v119_v10 = vld [vmem:[#allocation3 + $0x1d0] sm:$0xff] }
  0x2b   :  { %300 = vmatprep.subr.mxu0 %v68_v48  ;;  %376 = vmatpush1.msra.mxu1 %v133_v49  ;;  %v184_v11 = vld [vmem:[#allocation3 + $0x3d8] sm:$0xff]  ;;  %v118_v12 = vld [vmem:[#allocation3 + $0x1c8] sm:$0xff]  ;;  %v183_v13 = vld [vmem:[#allocation3 + $0x3d0] sm:$0xff] }
  0x2c   :  { %301 = vmatpush1.msra.mxu0 %v67_v50  ;;  %377 = vmatprep.subr.mxu1 %v132_v51  ;;  %v117_v14 = vld [vmem:[#allocation3 + $0x1c0] sm:$0xff]  ;;  %v182_v15 = vld [vmem:[#allocation3 + $0x3c8] sm:$0xff]  ;;  %v116_v16 = vld [vmem:[#allocation3 + $0x1b8] sm:$0xff] }
  0x2d   :  { %302 = vmatprep.subr.mxu0 %v66_v52  ;;  %378 = vmatpush1.msra.mxu1 %v131_v53  ;;  %v181_v17 = vld [vmem:[#allocation3 + $0x3c0] sm:$0xff]  ;;  %v115_v18 = vld [vmem:[#allocation3 + $0x1b0] sm:$0xff]  ;;  %v180_v19 = vld [vmem:[#allocation3 + $0x3b8] sm:$0xff] }
  0x2e   :  { %303 = vmatpush1.msra.mxu0 %v65_v54  ;;  %379 = vmatprep.subr.mxu1 %v130_v55  ;;  %v114_v20 = vld [vmem:[#allocation3 + $0x1a8] sm:$0xff]  ;;  %v179_v21 = vld [vmem:[#allocation3 + $0x3b0] sm:$0xff]  ;;  %v113_v22 = vld [vmem:[#allocation3 + $0x1a0] sm:$0xff] }
  0x2f   :  { %304 = vmatprep.subr.mxu0 %v64_v56  ;;  %380 = vmatpush1.msra.mxu1 %v129_v57  ;;  %v178_v23 = vld [vmem:[#allocation3 + $0x3a8] sm:$0xff]  ;;  %v112_v24 = vld [vmem:[#allocation3 + $0x198] sm:$0xff]  ;;  %v177_v25 = vld [vmem:[#allocation3 + $0x3a0] sm:$0xff] }
  0x30   :  { %305 = vmatpush1.msra.mxu0 %v63_v58  ;;  %381 = vmatprep.subr.mxu1 %v128_v59  ;;  %v111_v26 = vld [vmem:[#allocation3 + $0x190] sm:$0xff]  ;;  %v176_v27 = vld [vmem:[#allocation3 + $0x398] sm:$0xff]  ;;  %v110_v28 = vld [vmem:[#allocation3 + $0x188] sm:$0xff] }
  0x31   :  { %306 = vmatprep.subr.mxu0 %v62_v60  ;;  %382 = vmatpush1.msra.mxu1 %v127_v61  ;;  %v175_v29 = vld [vmem:[#allocation3 + $0x390] sm:$0xff]  ;;  %v109_v30 = vld [vmem:[#allocation3 + $0x180] sm:$0xff]  ;;  %v174_v31 = vld [vmem:[#allocation3 + $0x388] sm:$0xff] }
  0x32   :  { %307 = vmatpush1.msra.mxu0 %v61_v62  ;;  %383 = vmatprep.subr.mxu1 %v126_v63  ;;  %v108_v32 = vld [vmem:[#allocation3 + $0x178] sm:$0xff]  ;;  %v173_v33 = vld [vmem:[#allocation3 + $0x380] sm:$0xff]  ;;  %v107_v34 = vld [vmem:[#allocation3 + $0x170] sm:$0xff] }
  0x33   :  { %308 = vmatprep.subr.mxu0 %v124_v0  ;;  %384 = vmatpush1.msra.mxu1 %v125_v1  ;;  %v172_v35 = vld [vmem:[#allocation3 + $0x378] sm:$0xff]  ;;  %v106_v36 = vld [vmem:[#allocation3 + $0x168] sm:$0xff]  ;;  %v171_v37 = vld [vmem:[#allocation3 + $0x370] sm:$0xff] }
  0x34   :  { %309 = vmatpush2.msra.mxu0 %v123_v2  ;;  %385 = vmatprep.subr.mxu1 %v188_v3  ;;  %v105_v38 = vld [vmem:[#allocation3 + $0x160] sm:$0xff]  ;;  %v170_v39 = vld [vmem:[#allocation3 + $0x368] sm:$0xff]  ;;  %v104_v40 = vld [vmem:[#allocation3 + $0x158] sm:$0xff] }
  0x35   :  { %310 = vmatprep.subr.mxu0 %v122_v4  ;;  %386 = vmatpush2.msra.mxu1 %v187_v5  ;;  %v169_v41 = vld [vmem:[#allocation3 + $0x360] sm:$0xff]  ;;  %v103_v42 = vld [vmem:[#allocation3 + $0x150] sm:$0xff]  ;;  %v168_v43 = vld [vmem:[#allocation3 + $0x358] sm:$0xff] }
  0x36   :  { %311 = vmatpush2.msra.mxu0 %v121_v6  ;;  %387 = vmatprep.subr.mxu1 %v186_v7  ;;  %v102_v44 = vld [vmem:[#allocation3 + $0x148] sm:$0xff]  ;;  %v167_v45 = vld [vmem:[#allocation3 + $0x350] sm:$0xff]  ;;  %v101_v46 = vld [vmem:[#allocation3 + $0x140] sm:$0xff] }
  0x37   :  { %312 = vmatprep.subr.mxu0 %v120_v8  ;;  %388 = vmatpush2.msra.mxu1 %v185_v9  ;;  %v166_v47 = vld [vmem:[#allocation3 + $0x348] sm:$0xff]  ;;  %v100_v48 = vld [vmem:[#allocation3 + $0x138] sm:$0xff]  ;;  %v165_v49 = vld [vmem:[#allocation3 + $0x340] sm:$0xff] }
  0x38   :  { %313 = vmatpush2.msra.mxu0 %v119_v10  ;;  %389 = vmatprep.subr.mxu1 %v184_v11  ;;  %v99_v50 = vld [vmem:[#allocation3 + $0x130] sm:$0xff]  ;;  %v164_v51 = vld [vmem:[#allocation3 + $0x338] sm:$0xff]  ;;  %v98_v52 = vld [vmem:[#allocation3 + $0x128] sm:$0xff] }
  0x39   :  { %314 = vmatprep.subr.mxu0 %v118_v12  ;;  %390 = vmatpush2.msra.mxu1 %v183_v13  ;;  %v163_v53 = vld [vmem:[#allocation3 + $0x330] sm:$0xff]  ;;  %v97_v54 = vld [vmem:[#allocation3 + $0x120] sm:$0xff]  ;;  %v162_v55 = vld [vmem:[#allocation3 + $0x328] sm:$0xff] }
  0x3a   :  { %315 = vmatpush2.msra.mxu0 %v117_v14  ;;  %391 = vmatprep.subr.mxu1 %v182_v15  ;;  %v96_v56 = vld [vmem:[#allocation3 + $0x118] sm:$0xff]  ;;  %v161_v57 = vld [vmem:[#allocation3 + $0x320] sm:$0xff]  ;;  %v95_v58 = vld [vmem:[#allocation3 + $0x110] sm:$0xff] }
  0x3b   :  { %316 = vmatprep.subr.mxu0 %v116_v16  ;;  %392 = vmatpush2.msra.mxu1 %v181_v17  ;;  %v160_v59 = vld [vmem:[#allocation3 + $0x318] sm:$0xff]  ;;  %v94_v60 = vld [vmem:[#allocation3 + $0x108] sm:$0xff]  ;;  %v93_v62 = vld [vmem:[#allocation3 + $0x100] sm:$0xff] }
  0x3c   :  { %317 = vmatpush2.msra.mxu0 %v115_v18  ;;  %393 = vmatprep.subr.mxu1 %v180_v19  ;;  %v48_v61 = vld [vmem:[%s1143_s0 + $0x8] sm:$0xff]  ;;  %v159_v63 = vld [vmem:[#allocation3 + $0x310] sm:$0xff]  ;;  %v47_v0 = vld [vmem:[%s1143_s0] sm:$0xff] }
  0x3d   :  { %318 = vmatprep.subr.mxu0 %v114_v20  ;;  %394 = vmatpush2.msra.mxu1 %v179_v21  ;;  %v158_v1 = vld [vmem:[#allocation3 + $0x308] sm:$0xff]  ;;  %v220_v2 = vld [vmem:[#allocation3 + $0x4f8] sm:$0xff]  ;;  %v157_v3 = vld [vmem:[#allocation3 + $0x300] sm:$0xff] }
  0x3e   :  { %319 = vmatpush2.msra.mxu0 %v113_v22  ;;  %395 = vmatprep.subr.mxu1 %v178_v23  ;;  %v50_v4 = vld [vmem:[%s1143_s0 + $0x18] sm:$0xff]  ;;  %v49_v6 = vld [vmem:[%s1143_s0 + $0x10] sm:$0xff]  ;;  %v217_v8 = vld [vmem:[#allocation3 + $0x4e0] sm:$0xff] }
  0x3f   :  { %320 = vmatprep.subr.mxu0 %v112_v24  ;;  %396 = vmatpush2.msra.mxu1 %v177_v25  ;;  %v219_v5 = vld [vmem:[#allocation3 + $0x4f0] sm:$0xff]  ;;  %v218_v7 = vld [vmem:[#allocation3 + $0x4e8] sm:$0xff]  ;;  %v55_v9 = vld [vmem:[%s1143_s0 + $0x40] sm:$0xff] }
  0x40   :  { %321 = vmatpush2.msra.mxu0 %v111_v26  ;;  %397 = vmatprep.subr.mxu1 %v176_v27  ;;  %v216_v10 = vld [vmem:[#allocation3 + $0x4d8] sm:$0xff]  ;;  %v215_v12 = vld [vmem:[#allocation3 + $0x4d0] sm:$0xff]  ;;  %v214_v14 = vld [vmem:[#allocation3 + $0x4c8] sm:$0xff] }
  0x41   :  { %322 = vmatprep.subr.mxu0 %v110_v28  ;;  %398 = vmatpush2.msra.mxu1 %v175_v29  ;;  %v256_v11 = vld [vmem:[#allocation3 + $0x618] sm:$0xff]  ;;  %v255_v13 = vld [vmem:[#allocation3 + $0x610] sm:$0xff]  ;;  %v213_v16 = vld [vmem:[#allocation3 + $0x4c0] sm:$0xff] }
  0x42   :  { %323 = vmatpush2.msra.mxu0 %v109_v30  ;;  %399 = vmatprep.subr.mxu1 %v174_v31  ;;  %v54_v15 = vld [vmem:[%s1143_s0 + $0x38] sm:$0xff]  ;;  %v57_v17 = vld [vmem:[%s1143_s0 + $0x50] sm:$0xff]  ;;  %v56_v19 = vld [vmem:[%s1143_s0 + $0x48] sm:$0xff]  ;;  %v915_v31 = vmov 0.0  }
  0x43   :  { %324 = vmatprep.subr.mxu0 %v108_v32  ;;  %400 = vmatpush2.msra.mxu1 %v173_v33  ;;  %v212_v18 = vld [vmem:[#allocation3 + $0x4b8] sm:$0xff]  ;;  %v211_v20 = vld [vmem:[#allocation3 + $0x4b0] sm:$0xff]  ;;  %v254_v21 = vld [vmem:[#allocation3 + $0x608] sm:$0xff] }
  0x44   :  { %325 = vmatpush2.msra.mxu0 %v107_v34  ;;  %401 = vmatprep.subr.mxu1 %v172_v35  ;;  %v210_v22 = vld [vmem:[#allocation3 + $0x4a8] sm:$0xff]  ;;  %v253_v23 = vld [vmem:[#allocation3 + $0x600] sm:$0xff]  ;;  %v208_v26 = vld [vmem:[#allocation3 + $0x498] sm:$0xff] }
  0x45   :  { %326 = vmatprep.subr.mxu0 %v106_v36  ;;  %402 = vmatpush2.msra.mxu1 %v171_v37  ;;  %v209_v24 = vld [vmem:[#allocation3 + $0x4a0] sm:$0xff]  ;;  %v207_v27 = vld [vmem:[#allocation3 + $0x490] sm:$0xff]  ;;  %v206_v29 = vld [vmem:[#allocation3 + $0x488] sm:$0xff] }
  0x46   :  { %327 = vmatpush2.msra.mxu0 %v105_v38  ;;  %403 = vmatprep.subr.mxu1 %v170_v39  ;;  %v52_v25 = vld [vmem:[%s1143_s0 + $0x28] sm:$0xff]  ;;  %v53_v28 = vld [vmem:[%s1143_s0 + $0x30] sm:$0xff]  ;;  %v204_v32 = vld [vmem:[#allocation3 + $0x478] sm:$0xff] }
  0x47   :  { %328 = vmatprep.subr.mxu0 %v104_v40  ;;  %404 = vmatpush2.msra.mxu1 %v169_v41  ;;  %v205_v30 = vld [vmem:[#allocation3 + $0x480] sm:$0xff]  ;;  %v203_v33 = vld [vmem:[#allocation3 + $0x470] sm:$0xff]  ;;  %v202_v35 = vld [vmem:[#allocation3 + $0x468] sm:$0xff] }
  0x48   :  { %329 = vmatpush2.msra.mxu0 %v103_v42  ;;  %405 = vmatprep.subr.mxu1 %v168_v43  ;;  %v60_v34 = vld [vmem:[%s1143_s0 + $0x68] sm:$0xff]  ;;  %v200_v37 = vld [vmem:[#allocation3 + $0x458] sm:$0xff]  ;;  %v199_v38 = vld [vmem:[#allocation3 + $0x450] sm:$0xff] }
  0x49   :  { %330 = vmatprep.subr.mxu0 %v102_v44  ;;  %406 = vmatpush2.msra.mxu1 %v167_v45  ;;  %v201_v36 = vld [vmem:[#allocation3 + $0x460] sm:$0xff]  ;;  %v198_v39 = vld [vmem:[#allocation3 + $0x448] sm:$0xff]  ;;  %v196_v41 = vld [vmem:[#allocation3 + $0x438] sm:$0xff] }
  0x4a   :  { %331 = vmatpush2.msra.mxu0 %v101_v46  ;;  %407 = vmatprep.subr.mxu1 %v166_v47  ;;  %v197_v40 = vld [vmem:[#allocation3 + $0x440] sm:$0xff]  ;;  %v195_v42 = vld [vmem:[#allocation3 + $0x430] sm:$0xff]  ;;  %v194_v43 = vld [vmem:[#allocation3 + $0x428] sm:$0xff] }
  0x4b   :  { %332 = vmatprep.subr.mxu0 %v100_v48  ;;  %408 = vmatpush2.msra.mxu1 %v165_v49  ;;  %v193_v44 = vld [vmem:[#allocation3 + $0x420] sm:$0xff]  ;;  %v192_v45 = vld [vmem:[#allocation3 + $0x418] sm:$0xff]  ;;  %v191_v46 = vld [vmem:[#allocation3 + $0x410] sm:$0xff] }
  0x4c   :  { %333 = vmatpush2.msra.mxu0 %v99_v50  ;;  %409 = vmatprep.subr.mxu1 %v164_v51  ;;  %v190_v47 = vld [vmem:[#allocation3 + $0x408] sm:$0xff]  ;;  %v189_v48 = vld [vmem:[#allocation3 + $0x400] sm:$0xff]  ;;  %v252_v49 = vld [vmem:[#allocation3 + $0x5f8] sm:$0xff] }
  0x4d   :  { %334 = vmatprep.subr.mxu0 %v98_v52  ;;  %410 = vmatpush2.msra.mxu1 %v163_v53  ;;  %v251_v50 = vld [vmem:[#allocation3 + $0x5f0] sm:$0xff]  ;;  %v250_v51 = vld [vmem:[#allocation3 + $0x5e8] sm:$0xff]  ;;  %v249_v52 = vld [vmem:[#allocation3 + $0x5e0] sm:$0xff] }
  0x4e   :  { %335 = vmatpush2.msra.mxu0 %v97_v54  ;;  %411 = vmatprep.subr.mxu1 %v162_v55  ;;  %v248_v53 = vld [vmem:[#allocation3 + $0x5d8] sm:$0xff]  ;;  %v247_v54 = vld [vmem:[#allocation3 + $0x5d0] sm:$0xff]  ;;  %v246_v55 = vld [vmem:[#allocation3 + $0x5c8] sm:$0xff] }
  0x4f   :  { %336 = vmatprep.subr.mxu0 %v96_v56  ;;  %412 = vmatpush2.msra.mxu1 %v161_v57  ;;  %v245_v56 = vld [vmem:[#allocation3 + $0x5c0] sm:$0xff]  ;;  %v244_v57 = vld [vmem:[#allocation3 + $0x5b8] sm:$0xff] }
  0x50   :  { %337 = vmatpush2.msra.mxu0 %v95_v58  ;;  %413 = vmatprep.subr.mxu1 %v160_v59  ;;  %v243_v58 = vld [vmem:[#allocation3 + $0x5b0] sm:$0xff]  ;;  %v242_v59 = vld [vmem:[#allocation3 + $0x5a8] sm:$0xff] }
  0x51   :  { %338 = vmatprep.subr.mxu0 %v94_v60  ;;  %340 = vmatprep.mubr.f32.mxu0 %v48_v61  ;;  %v241_v60 = vld [vmem:[#allocation3 + $0x5a0] sm:$0xff]  ;;  %v240_v61 = vld [vmem:[#allocation3 + $0x598] sm:$0xff] }
  0x52   :  { %339 = vmatpush2.msra.mxu0 %v93_v62  ;;  %414 = vmatpush2.msra.mxu1 %v159_v63  ;;  %v239_v62 = vld [vmem:[#allocation3 + $0x590] sm:$0xff]  ;;  %v238_v63 = vld [vmem:[#allocation3 + $0x588] sm:$0xff] }
  0x53   :  { %341 = vmatmul.mubr.f32.vlgmr.msra.gmra.mxu0 %v47_v0  ;;  %415 = vmatprep.subr.mxu1 %v158_v1  ;;  %v237_v0 = vld [vmem:[#allocation3 + $0x580] sm:$0xff]  ;;  %v236_v1 = vld [vmem:[#allocation3 + $0x578] sm:$0xff] }
  0x54   :  { %430 = vmatprep.subr.mxu0 %v220_v2  ;;  %416 = vmatpush2.msra.mxu1 %v157_v3  ;;  %v235_v2 = vld [vmem:[#allocation3 + $0x570] sm:$0xff]  ;;  %v234_v3 = vld [vmem:[#allocation3 + $0x568] sm:$0xff] }
  0x55   :  { %417 = vmatprep.mubr.f32.mxu1 %v50_v4  ;;  %431 = vmatpush1.msra.mxu0 %v219_v5  ;;  %v233_v4 = vld [vmem:[#allocation3 + $0x560] sm:$0xff]  ;;  %v232_v5 = vld [vmem:[#allocation3 + $0x558] sm:$0xff] }
  0x56   :  { %418 = vmatmul.mubr.f32.vlgmr.msra.gmra.mxu1 %v49_v6  ;;  %432 = vmatprep.subr.mxu0 %v218_v7  ;;  %v231_v6 = vld [vmem:[#allocation3 + $0x550] sm:$0xff]  ;;  %v230_v7 = vld [vmem:[#allocation3 + $0x548] sm:$0xff] }
  0x57   :  { %433 = vmatpush1.msra.mxu0 %v217_v8  ;;  %346 = vmatprep.mubr.f32.mxu0 %v55_v9  ;;  %v229_v8 = vld [vmem:[#allocation3 + $0x540] sm:$0xff]  ;;  %v228_v9 = vld [vmem:[#allocation3 + $0x538] sm:$0xff] }
  0x58   :  { %434 = vmatprep.subr.mxu0 %v216_v10  ;;  %535 = vmatprep.subr.mxu1 %v256_v11  ;;  %v227_v10 = vld [vmem:[#allocation3 + $0x530] sm:$0xff]  ;;  %v226_v11 = vld [vmem:[#allocation3 + $0x528] sm:$0xff] }
  0x59   :  { %435 = vmatpush1.msra.mxu0 %v215_v12  ;;  %536 = vmatpush1.msra.mxu1 %v255_v13  ;;  %v225_v12 = vld [vmem:[#allocation3 + $0x520] sm:$0xff]  ;;  %v224_v13 = vld [vmem:[#allocation3 + $0x518] sm:$0xff] }
  0x5a   :  { %436 = vmatprep.subr.mxu0 %v214_v14  ;;  %347 = vmatmul.mubr.f32.gmra.mxu0 %v54_v15  ;;  %v223_v14 = vld [vmem:[#allocation3 + $0x510] sm:$0xff]  ;;  %v222_v15 = vld [vmem:[#allocation3 + $0x508] sm:$0xff] }
  0x5b   :  { %437 = vmatpush1.msra.mxu0 %v213_v16  ;;  %423 = vmatprep.mubr.f32.mxu1 %v57_v17  ;;  %v221_v16 = vld [vmem:[#allocation3 + $0x500] sm:$0xff] }
  0x5c   :  { %438 = vmatprep.subr.mxu0 %v212_v18  ;;  %424 = vmatmul.mubr.f32.gmra.mxu1 %v56_v19  ;;  %v51_v17 = vld [vmem:[%s1143_s0 + $0x20] sm:$0xff]  ;;  %v58_v19 = vld [vmem:[%s1143_s0 + $0x58] sm:$0xff] }
  0x5d   :  { %439 = vmatpush1.msra.mxu0 %v211_v20  ;;  %537 = vmatprep.subr.mxu1 %v254_v21  ;;  %v59_v18 = vld [vmem:[%s1143_s0 + $0x60] sm:$0xff]  ;;  %v623_v20 = vld [vmem:[%s1146_s3 + $0xf8] sm:$0xff] }
  0x5e   :  { %440 = vmatprep.subr.mxu0 %v210_v22  ;;  %538 = vmatpush1.msra.mxu1 %v253_v23  ;;  %v607_v21 = vld [vmem:[%s1146_s3 + $0x78] sm:$0xff]  ;;  %v622_v22 = vld [vmem:[%s1146_s3 + $0xf0] sm:$0xff] }
  0x5f   :  { %441 = vmatpush1.msra.mxu0 %v209_v24  ;;  %494 = vmatprep.mubr.f32.mxu0 %v52_v25  ;;  %v606_v23 = vld [vmem:[%s1146_s3 + $0x70] sm:$0xff]  ;;  %v621_v24 = vld [vmem:[%s1146_s3 + $0xe8] sm:$0xff] }
  0x60   :  { %442 = vmatprep.subr.mxu0 %v208_v26  ;;  %571 = vmatprep.mubr.f32.mxu1 %v915_v31  ;;  %v605_v25 = vld [vmem:[%s1146_s3 + $0x68] sm:$0xff]  ;;  %v620_v26 = vld [vmem:[%s1146_s3 + $0xe0] sm:$0xff] }
  0x61   :  { %443 = vmatpush1.msra.mxu0 %v207_v27  ;;  %787 = vmatmul.mubr.msk.f32.vlgmr.msra.gmra.mxu1 %vm269_vm0, %v53_v28  ;;  %v604_v27 = vld [vmem:[%s1146_s3 + $0x60] sm:$0xff]  ;;  %v619_v28 = vld [vmem:[%s1146_s3 + $0xd8] sm:$0xff] }
  0x62   :  { %444 = vmatprep.subr.mxu0 %v206_v29  ;;  %577 = vmatprep.mubr.f32.mxu1 %v915_v31  ;;  %v603_v29 = vld [vmem:[%s1146_s3 + $0x58] sm:$0xff]  ;;  %v602_v31 = vld [vmem:[%s1146_s3 + $0x50] sm:$0xff] }
  0x63   :  { %445 = vmatpush1.msra.mxu0 %v205_v30  ;;  %792 = vmatprep.subr.mxu1 %v623_v20  ;;  %v618_v30 = vld [vmem:[%s1146_s3 + $0xd0] sm:$0xff] }
  0x64   :  { %446 = vmatprep.subr.mxu0 %v204_v32  ;;  %793 = vmatpush3.msra.mxu1 %v607_v21  ;;  %v617_v32 = vld [vmem:[%s1146_s3 + $0xc8] sm:$0xff] }
  0x65   :  { %447 = vmatpush1.msra.mxu0 %v203_v33  ;;  %788 = vmatmul.mubr.msk.f32.gmra.mxu1 %vm269_vm0, %v60_v34  ;;  %v601_v33 = vld [vmem:[%s1146_s3 + $0x48] sm:$0xff]  ;;  %v616_v34 = vld [vmem:[%s1146_s3 + $0xc0] sm:$0xff] }
  0x66   :  { %448 = vmatprep.subr.mxu0 %v202_v35  ;;  %794 = vmatprep.subr.mxu1 %v622_v22  ;;  %v600_v35 = vld [vmem:[%s1146_s3 + $0x40] sm:$0xff] }
  0x67   :  { %449 = vmatpush1.msra.mxu0 %v201_v36  ;;  %795 = vmatpush3.msra.mxu1 %v606_v23  ;;  %v615_v36 = vld [vmem:[%s1146_s3 + $0xb8] sm:$0xff] }
  0x68   :  { %450 = vmatprep.subr.mxu0 %v200_v37  ;;  %796 = vmatprep.subr.mxu1 %v621_v24  ;;  %v599_v37 = vld [vmem:[%s1146_s3 + $0x38] sm:$0xff] }
  0x69   :  { %451 = vmatpush1.msra.mxu0 %v199_v38  ;;  %797 = vmatpush3.msra.mxu1 %v605_v25  ;;  %v614_v38 = vld [vmem:[%s1146_s3 + $0xb0] sm:$0xff] }
  0x6a   :  { %452 = vmatprep.subr.mxu0 %v198_v39  ;;  %798 = vmatprep.subr.mxu1 %v620_v26  ;;  %v598_v39 = vld [vmem:[%s1146_s3 + $0x30] sm:$0xff] }
  0x6b   :  { %453 = vmatpush1.msra.mxu0 %v197_v40  ;;  %799 = vmatpush3.msra.mxu1 %v604_v27  ;;  %v613_v40 = vld [vmem:[%s1146_s3 + $0xa8] sm:$0xff] }
  0x6c   :  { %454 = vmatprep.subr.mxu0 %v196_v41  ;;  %800 = vmatprep.subr.mxu1 %v619_v28  ;;  %v597_v41 = vld [vmem:[%s1146_s3 + $0x28] sm:$0xff] }
  0x6d   :  { %455 = vmatpush1.msra.mxu0 %v195_v42  ;;  %801 = vmatpush3.msra.mxu1 %v603_v29  ;;  %v612_v42 = vld [vmem:[%s1146_s3 + $0xa0] sm:$0xff] }
  0x6e   :  { %456 = vmatprep.subr.mxu0 %v194_v43  ;;  %802 = vmatprep.subr.mxu1 %v618_v30  ;;  %v596_v43 = vld [vmem:[%s1146_s3 + $0x20] sm:$0xff] }
  0x6f   :  { %457 = vmatpush1.msra.mxu0 %v193_v44  ;;  %803 = vmatpush3.msra.mxu1 %v602_v31  ;;  %v611_v44 = vld [vmem:[%s1146_s3 + $0x98] sm:$0xff] }
  0x70   :  { %458 = vmatprep.subr.mxu0 %v192_v45  ;;  %804 = vmatprep.subr.mxu1 %v617_v32  ;;  %v595_v45 = vld [vmem:[%s1146_s3 + $0x18] sm:$0xff]  ;;  %v789_v32 = vld [vmem:[%s1147_s4] ss:$0 sm:$0xff]  ;;  %s916_s4 = smov [#allocation6]  }
  0x71   :  { %459 = vmatpush1.msra.mxu0 %v191_v46  ;;  %805 = vmatpush3.msra.mxu1 %v601_v33  ;;  %v610_v46 = vld [vmem:[%s1146_s3 + $0x90] sm:$0xff]  ;;  %s757_s25 = sshll.u32 %s916_s4, 4  ;;  %s758_s25 = int_to_ptr.vmem [resolvable:$true] %s757_s25 }
  0x72   :  { %460 = vmatprep.subr.mxu0 %v190_v47  ;;  %806 = vmatprep.subr.mxu1 %v616_v34  ;;  %v594_v47 = vld [vmem:[%s1146_s3 + $0x10] sm:$0xff]  ;;  %s866_s28 = scalar_lea.vmem %s758_s25, 512  ;;  %p871_p6 = scmp.lt.s32.totalorder %s758_s25, %s758_s25 }
  0x73   :  { %461 = vmatpush1.msra.mxu0 %v189_v48  ;;  %807 = vmatpush3.msra.mxu1 %v600_v35  ;;  %v609_v48 = vld [vmem:[%s1146_s3 + $0x88] sm:$0xff]  ;;  %p867_p5 = scmp.ne.s32.totalorder %s758_s25, %s866_s28  ;;  %p872_p7 = scmp.lt.s32.totalorder %s866_s28, %s866_s28 }
  0x74   :  { %462 = vmatprep.subr.mxu0 %v252_v49  ;;  %808 = vmatprep.subr.mxu1 %v615_v36  ;;  %v593_v49 = vld [vmem:[%s1146_s3 + $0x8] sm:$0xff] }
  0x75   :  { %463 = vmatpush2.msra.mxu0 %v251_v50  ;;  %809 = vmatpush3.msra.mxu1 %v599_v37  ;;  %v608_v50 = vld [vmem:[%s1146_s3 + $0x80] sm:$0xff]  ;;  %p873_p8 = por %p872_p7, %p871_p6 }
  0x76   :  { %464 = vmatprep.subr.mxu0 %v250_v51  ;;  %810 = vmatprep.subr.mxu1 %v614_v38  ;;  %v592_v51 = vld [vmem:[%s1146_s3] sm:$0xff] }
  0x77   :  { %465 = vmatpush2.msra.mxu0 %v249_v52  ;;  %811 = vmatpush3.msra.mxu1 %v598_v39  ;;  %v259_v52 = vlaneseq  ;;  %v790_v38 = vld [vmem:[%s1148_s5] ss:$0 sm:$0xff]  ;;  %p874_p9 = pnand %p873_p8, %p867_p5 }
  0x78   :  { %466 = vmatprep.subr.mxu0 %v248_v53  ;;  %812 = vmatprep.subr.mxu1 %v613_v40 }
  0x79   :  { %467 = vmatpush2.msra.mxu0 %v247_v54  ;;  %813 = vmatpush3.msra.mxu1 %v597_v41  ;;  %v260_v54 = vshrl.u32 %v259_v52, 7 }
  0x7a   :  { %468 = vmatprep.subr.mxu0 %v246_v55  ;;  %814 = vmatprep.subr.mxu1 %v612_v42 }
  0x7b   :  { %469 = vmatpush2.msra.mxu0 %v245_v56  ;;  %815 = vmatpush3.msra.mxu1 %v596_v43  ;;  %v261_v56 = vsub.s32 0, %v260_v54 }
  0x7c   :  { %470 = vmatprep.subr.mxu0 %v244_v57  ;;  %816 = vmatprep.subr.mxu1 %v611_v44  ;;  %v257_v57 = vld [vmem:[%s1145_s2] sm:$0x3] }
  0x7d   :  { %471 = vmatpush2.msra.mxu0 %v243_v58  ;;  %817 = vmatpush3.msra.mxu1 %v595_v45 }
  0x7e   :  { %472 = vmatprep.subr.mxu0 %v242_v59  ;;  %818 = vmatprep.subr.mxu1 %v610_v46 }
  0x7f   :  { %473 = vmatpush2.msra.mxu0 %v241_v60  ;;  %819 = vmatpush3.msra.mxu1 %v594_v47  ;;  %v265_v60 = vsub.s32 1, %v260_v54 }
  0x80   :  { %474 = vmatprep.subr.mxu0 %v240_v61  ;;  %820 = vmatprep.subr.mxu1 %v609_v48  ;;  %v262_v61 = vrot.slane %v257_v57, %v261_v56 }
  0x81   :  { %475 = vmatpush2.msra.mxu0 %v239_v62  ;;  %821 = vmatpush3.msra.mxu1 %v593_v49 }
  0x82   :  { %476 = vmatprep.subr.mxu0 %v238_v63  ;;  %822 = vmatprep.subr.mxu1 %v608_v50 }
  0x83   :  { %477 = vmatpush2.msra.mxu0 %v237_v0  ;;  %823 = vmatpush3.msra.mxu1 %v592_v51  ;;  %v266_v0 = vrot.slane %v257_v57, %v265_v60 }
  0x84   :  { %478 = vmatprep.subr.mxu0 %v236_v1 }
  0x85   :  { %479 = vmatpush2.msra.mxu0 %v235_v2 }
  0x86   :  { %480 = vmatprep.subr.mxu0 %v234_v3 }
  0x87   :  { %481 = vmatpush2.msra.mxu0 %v233_v4 }
  0x88   :  { %482 = vmatprep.subr.mxu0 %v232_v5 }
  0x89   :  { %483 = vmatpush2.msra.mxu0 %v231_v6 }
  0x8a   :  { %484 = vmatprep.subr.mxu0 %v230_v7 }
  0x8b   :  { %485 = vmatpush2.msra.mxu0 %v229_v8 }
  0x8c   :  { %486 = vmatprep.subr.mxu0 %v228_v9 }
  0x8d   :  { %487 = vmatpush2.msra.mxu0 %v227_v10 }
  0x8e   :  { %488 = vmatprep.subr.mxu0 %v226_v11 }
  0x8f   :  { %489 = vmatpush2.msra.mxu0 %v225_v12 }
  0x90   :  { %490 = vmatprep.subr.mxu0 %v224_v13 }
  0x91   :  { %491 = vmatpush2.msra.mxu0 %v223_v14 }
  0x92   :  { %492 = vmatprep.subr.mxu0 %v222_v15 }
  0x93   :  { %493 = vmatpush2.msra.mxu0 %v221_v16 }
  0x94   :  { %495 = vmatmul.mubr.f32.vlgmr.msra.gmra.mxu0 %v51_v17 }
  0x95   :  { %500 = vmatprep.mubr.f32.mxu0 %v59_v18 }
  0x98   :  { %501 = vmatmul.mubr.f32.gmra.mxu0 %v58_v19 }
 0x113   :  { %v342_v58 = vpop.f32.mrf.mxu0 }
 0x114   :  { %v343_v2 = vadd.f32 %v342_v58, %v262_v61 }
 0x115   :  { %v344_v62 = vpop.f32.mrf.mxu0 }
 0x116   :  { %v419_v53 = vpop.f32.mrf.mxu1  ;;  %v345_v4 = vadd.f32 %v344_v62, %v266_v0 }
 0x117   :  { %v420_v6 = vadd.f32 %v419_v53, %v343_v2 }
 0x118   :  { %v421_v55 = vpop.f32.mrf.mxu1 }
 0x119   :  { %v422_v10 = vadd.f32 %v421_v55, %v345_v4 }
 0x11a   :  { %v348_v1 = vpop.f32.mrf.mxu0 }
 0x11b   :  { %v349_v7 = vadd.f32 %v348_v1, %v262_v61 }
 0x11c   :  { %v425_v59 = vpop.f32.mrf.mxu1  ;;  %v350_v5 = vpop.f32.mrf.mxu0 }
 0x11d   :  { %v351_v11 = vadd.f32 %v350_v5, %v266_v0  ;;  %v426_v14 = vadd.f32 %v425_v59, %v349_v7 }
 0x11e   :  { %v427_v63 = vpop.f32.mrf.mxu1 }
 0x11f   :  { %v428_v19 = vadd.f32 %v427_v63, %v351_v11 }
 0x121   :  { %v573_v3 = vpop.f32.mrf.mxu1 }
 0x123   :  { %v575_v9 = vpop.f32.mrf.mxu1 }
 0x125   :  { %v579_v18 = vpop.f32.mrf.mxu1 }
 0x127   :  { %v581_v27 = vpop.f32.mrf.mxu1 }
 0x154   :  { %v496_v8 = vpop.f32.mrf.mxu0 }
 0x155   :  { %v497_v12 = vadd.f32 %v496_v8, %v420_v6 }
 0x156   :  { %v498_v13 = vpop.f32.mrf.mxu0 }
 0x157   :  { %v574_v15 = vadd.f32 %v573_v3, %v497_v12  ;;  %v499_v16 = vadd.f32 %v498_v13, %v422_v10 }
 0x158   :  { %v502_v17 = vpop.f32.mrf.mxu0 }
 0x159   :  { %v584_v20 = vmax.f32 %v574_v15, 0.0  ;;  %v576_v21 = vadd.f32 %v575_v9, %v499_v16  ;;  %v503_v22 = vadd.f32 %v502_v17, %v426_v14 }
 0x15a   :  { %v504_v23 = vpop.f32.mrf.mxu0 }
 0x15b   :  { %588 = vst [vmem:[#allocation6] sm:$0xff] %v584_v20  ;;  %v585_v24 = vmax.f32 %v576_v21, 0.0  ;;  %v580_v25 = vadd.f32 %v579_v18, %v503_v22  ;;  %v505_v26 = vadd.f32 %v504_v23, %v428_v19 }
 0x15d   :  { %589 = vst [vmem:[#allocation6 + $0x8] sm:$0xff] %v585_v24  ;;  %v586_v28 = vmax.f32 %v580_v25, 0.0  ;;  %v582_v29 = vadd.f32 %v581_v27, %v505_v26  ;;  %695 = vmatprep.mubr.f32.mxu1 %v585_v24 }
 0x15e   :  { %696 = vmatmul.mubr.f32.vlgmr.msra.gmra.mxu1 %v584_v20 }
 0x15f   :  { %590 = vst [vmem:[#allocation6 + $0x10] sm:$0xff] %v586_v28  ;;  %v587_v30 = vmax.f32 %v582_v29, 0.0 }
 0x161   :  { %591 = vst [vmem:[#allocation6 + $0x18] sm:$0xff] %v587_v30  ;;  %700 = vmatprep.mubr.f32.mxu1 %v587_v30 }
 0x162   :  { %701 = vmatmul.mubr.f32.gmra.mxu1 %v586_v28 }
 0x21e   :  { %v824_v31 = vpop.f32.mrf.mxu1 }
 0x220   :  { %v825_v33 = vpop.f32.mrf.mxu1 }
 0x221   :  { %v826_v34 = vadd.f32 %v825_v33, %v824_v31 }
 0x222   :  { %v827_v35 = vpop.f32.mrf.mxu1 }
 0x223   :  { %v698_v36 = vadd.f32 %v826_v34, %v789_v32 }
 0x224   :  { %v828_v37 = vpop.f32.mrf.mxu1 }
 0x225   :  { %v706_v39 = vmax.f32 %v698_v36, 0.0  ;;  %v829_v40 = vadd.f32 %v828_v37, %v827_v35 }
 0x227   :  { %v703_v41 = vadd.f32 %v829_v40, %v789_v32  ;;  %v718_v42 = vmul.f32 %v790_v38, %v706_v39  ;;  %709 = vst.msk [vmem:[#allocation7] sm:$0xff] %vm708_vm1, %v706_v39 }
 0x229   :  { %v707_v43 = vmax.f32 %v703_v41, 0.0  ;;  %v720_v44 = vsel %vm708_vm1, %v718_v42, 0.0 }
 0x22a   :  { %721 = vadd.xlane.f32.xlu0 %v720_v44 }
 0x22b   :  { %710 = vst.msk [vmem:[#allocation7 + $0x8] sm:$0xff] %vm708_vm1, %v707_v43  ;;  %v719_v45 = vmul.f32 %v790_v38, %v707_v43 }
 0x22d   :  { %v723_v46 = vsel %vm708_vm1, %v719_v45, 0.0 }
 0x22e   :  { %724 = vadd.xlane.f32.xlu0 %v723_v46 }
 0x22f   :  { %877 = shalt.err (!%p874_p9)
}
 0x230   :  { %763 = dma.vmem_to_hbm [thread:$0]  %s758_s25, 512, %s1151_s8, [#allocation5], %s913_s14, %s913_s14, %s914_s15  }
 0x231   :  { %s886_s30 = scalar_lea.vmem %s770_s27, 256  ;;  %p891_p11 = scmp.lt.s32.totalorder %s770_s27, %s770_s27 }
 0x232   :  { %p887_p10 = scmp.ne.s32.totalorder %s770_s27, %s886_s30  ;;  %p892_p12 = scmp.lt.s32.totalorder %s886_s30, %s886_s30 }
 0x234   :  { %p893_p13 = por %p892_p12, %p891_p11 }
 0x236   :  { %p894_p0 = pnand %p893_p13, %p887_p10 }
 0x238   :  { %897 = shalt.err (!%p894_p0)
}
 0x239   :  { %s918_s0 = smov 128   ;;  %s919_s10 = smov 8   ;;  %v791_v47 = vld [vmem:[#allocation2] ss:$0 sm:$0xff]  ;;  %vm747_vm2 = vcmask 7168  }
 0x23a   :  { %775 = dma.vmem_to_hbm [thread:$0]  %s770_s27, 256, %s1152_s9, [#allocation8], %s918_s0, %s918_s0, %s919_s10  }
 0x2b3   :  { %v722_v48 = vpop.xlane.xlu0 %721 }
 0x2b4   :  { %v733_v49 = vadd.f32 %v791_v47, %v722_v48 }
 0x2b6   :  { %v735_v50 = vsub.f32 0.0, %v733_v49 }
 0x2b7   :  { %v725_v51 = vpop.xlane.xlu0 %724 }
 0x2b8   :  { %v737_v52 = vmul.f32 1.442695, %v735_v50  ;;  %v734_v53 = vadd.f32 %v791_v47, %v725_v51 }
 0x2ba   :  { %838 = vpow2.f32 %v737_v52  ;;  %v736_v54 = vsub.f32 0.0, %v734_v53 }
 0x2bc   :  { %v739_v55 = vmul.f32 1.442695, %v736_v54 }
 0x2be   :  { %840 = vpow2.f32 %v739_v55 }
 0x2c7   :  { %v839_v56 = vpop.eup %838 }
 0x2c8   :  { %v741_v57 = vadd.f32 1.0, %v839_v56 }
 0x2ca   :  { %842 = vrcp.f32 %v741_v57 }
 0x2cb   :  { %v841_v58 = vpop.eup %840 }
 0x2cc   :  { %v742_v59 = vadd.f32 1.0, %v841_v58 }
 0x2ce   :  { %844 = vrcp.f32 %v742_v59 }
 0x2d7   :  { %v843_v60 = vpop.eup %842 }
 0x2d8   :  { %748 = vst.msk [vmem:[%s1150_s7] sm:$0xff] %vm747_vm2, %v843_v60 }
 0x2db   :  { %v845_v61 = vpop.eup %844 }
 0x2dc   :  { %749 = vst.msk [vmem:[%s1150_s7 + $0x8] sm:$0xff] %vm747_vm2, %v845_v61 }
 0x2dd   :  { %908 = dma.done.wait [#allocation5], 512  }
 0x2de   :  { %909 = vsyncadd [#allocation5], 4294966784 }
 0x2df   :  { %910 = dma.done.wait [#allocation8], 256  }
 0x2e0   :  { %911 = vsyncadd [#allocation8], 4294967040 }
 0x2e1   :  { %784 = vsyncpa [#allocation4], 1 }
 0x2e2   :  { %785 = vsyncpa [#allocation5], 1 }
 0x2e3   :  { %786 = vsyncpa [#allocation8], 1 }

</bundles_post_ra>
